<compile_context>
chip_gen: v7x
topology: tpu7x:2x2x1
jax: 0.10.0
libtpu: 0.0.40
codegen_flags: <defaults>
</compile_context>

<pallas_src>
import jax
import jax.numpy as jnp
from jax.experimental import pallas as pl
from jax.experimental.pallas import tpu as pltpu

_LANE = 128
_SUBLANE = 8


def _gated_attention_kernel(y_ref, w_ref, b_ref, x_ref, z_ref, att_ref):
    """Per grid step:
      y_ref:   (1, dim_y)        sentence embedding (resident)
      w_ref:   (tile_h, dim_y)   Linear weight rows for this hidden tile
      b_ref:   (tile_h, 1)       Linear bias rows
      x_ref:   (tile_h, tile_s)  conv-map slab (streamed)
      z_ref:   (tile_h, tile_s)  gated output (streamed)
      att_ref: (tile_h, 1) f32   VMEM scratch: gate for this hidden tile
    """
    # Gate hoisted out of the streamed spatial loop: computed once per hidden
    # tile on VPU (mul) + XLU (lane reduce) + EUP (sigmoid), no MXU involved,
    # then reused from scratch for every spatial tile of that hidden tile.
    @pl.when(pl.program_id(1) == 0)
    def _():
        prod = w_ref[...].astype(jnp.float32) * y_ref[...].astype(jnp.float32)
        gate = jnp.sum(prod, axis=-1, keepdims=True) + b_ref[...].astype(jnp.float32)
        att_ref[...] = jax.nn.sigmoid(gate)

    # Multiply in f32, cast once at the store (exact for f32 inputs; avoids a
    # bf16-emulated vmul on v5e and double-rounding of the gate for bf16 x).
    z_ref[...] = (x_ref[...].astype(jnp.float32) * att_ref[...]).astype(z_ref.dtype)


def _round_up(x, m):
    return ((x + m - 1) // m) * m


def _largest_divisor_tile(extent, unit, cap):
    """Largest multiple of `unit` that divides `extent` and is <= cap.
    `extent` is guaranteed to be a multiple of `unit` by wrapper-side padding."""
    best = unit
    t = unit
    lim = max(min(extent, cap), unit)
    while t <= lim:
        if extent % t == 0:
            best = t
        t += unit
    return best


def _chip_budget():
    """Return (per_tile_budget_bytes, vmem_limit_bytes, multi_core).

    v7x: 64 MiB physical VMEM per TC (32 MiB scoped default), 2 TensorCores.
    v5e / v6e: 128 MiB physical VMEM, 1 TensorCore.
    On detection failure: keep the conservative (v7x-safe) VMEM budget but do
    not force a block split (splitting is pure overhead on 1-TC chips, while
    an un-split grid is still correct everywhere).
    """
    try:
        vmem_cap = int(pltpu.get_tpu_info().vmem_capacity_bytes)
    except Exception:
        return 8 * 1024 * 1024, 32 * 1024 * 1024, False
    if vmem_cap <= 64 * 1024 * 1024:
        return 8 * 1024 * 1024, 32 * 1024 * 1024, True      # v7x-like
    return 16 * 1024 * 1024, 64 * 1024 * 1024, False        # v5e / v6e


def gated_attention(x, y, w, b, dim_x, hidden_dim):
    """x: (1, hidden, dim_x, dim_x) NCHW, y: (1, dim_y),
    w: (hidden, dim_y) (PyTorch Linear layout), b: (hidden,).
    Returns z: (1, hidden * dim_x * dim_x)."""
    dim_y = y.shape[-1]
    spatial = dim_x * dim_x

    tile_budget, vmem_limit, multi_core = _chip_budget()

    # Lane-dense elementwise slab: channels on sublanes, flat spatial on lanes.
    x2d = x.reshape(hidden_dim, spatial)
    y2d = y.reshape(1, dim_y)
    b2d = b.reshape(hidden_dim, 1)

    # Pad to (8, 128)-valid extents instead of a full-extent / lane-masked
    # fallback block; the pad rows gate to 0.5 * 0 = 0 and are sliced off.
    hidden_p = _round_up(hidden_dim, _SUBLANE)
    spatial_p = _round_up(spatial, _LANE)
    if hidden_p != hidden_dim or spatial_p != spatial:
        x2d = jnp.pad(x2d, ((0, hidden_p - hidden_dim), (0, spatial_p - spatial)))
        w = jnp.pad(w, ((0, hidden_p - hidden_dim), (0, 0)))
        b2d = jnp.pad(b2d, ((0, hidden_p - hidden_dim), (0, 0)))

    itemsize = x2d.dtype.itemsize

    # Prefer full-spatial-row tiles (one contiguous HBM DMA per x/z tile, and
    # the spatial grid axis collapses to one block).  Only tile the lane axis
    # when even an 8-row, full-width, double-buffered x+z tile overflows.
    if _SUBLANE * 4 * spatial_p * itemsize <= tile_budget:
        tile_s = spatial_p
    else:
        lane_cap = max(_LANE, tile_budget // (_SUBLANE * 4 * itemsize))
        tile_s = _largest_divisor_tile(spatial_p, _LANE, lane_cap)

    # Sublane tile: fill the budget, accounting for ALL double-buffered VMEM
    # residents per hidden row: x + z tiles, the lane-padded W / bias tiles,
    # and the f32 gate scratch.
    row_bytes = (
        2 * tile_s * itemsize                                 # x double-buffer
        + 2 * tile_s * itemsize                               # z double-buffer
        + 2 * _round_up(dim_y, _LANE) * w.dtype.itemsize      # W double-buffer
        + 2 * _LANE * b2d.dtype.itemsize                      # bias double-buffer
        + _LANE * 4                                           # att scratch (f32)
    )
    cap_h = max(_SUBLANE, (tile_budget // row_bytes) // _SUBLANE * _SUBLANE)
    tile_h = _largest_divisor_tile(hidden_p, _SUBLANE, cap_h)

    # Megacore (v7x only): give the parallel hidden axis an even block count
    # (>= 2) so both TensorCores pull HBM concurrently with equal work.
    if multi_core:
        n_h = hidden_p // tile_h
        if n_h % 2 == 1 and tile_h % (2 * _SUBLANE) == 0:
            tile_h //= 2

    grid = (hidden_p // tile_h, spatial_p // tile_s)

    cost = pl.CostEstimate(
        flops=int(hidden_p * spatial_p + 2 * hidden_p * dim_y),
        transcendentals=int(hidden_p),
        bytes_accessed=int(
            2 * hidden_p * spatial_p * itemsize
            + hidden_p * dim_y * w.dtype.itemsize
            + hidden_p * b2d.dtype.itemsize
            + dim_y * y2d.dtype.itemsize
        ),
    )

    out = pl.pallas_call(
        _gated_attention_kernel,
        out_shape=jax.ShapeDtypeStruct((hidden_p, spatial_p), x2d.dtype),
        grid=grid,
        in_specs=[
            pl.BlockSpec((1, dim_y), lambda i, j: (0, 0)),         # y (tiny, resident)
            pl.BlockSpec((tile_h, dim_y), lambda i, j: (i, 0)),    # W rows for tile i
            pl.BlockSpec((tile_h, 1), lambda i, j: (i, 0)),        # bias rows for tile i
            pl.BlockSpec((tile_h, tile_s), lambda i, j: (i, j)),   # x tile (streamed)
        ],
        out_specs=pl.BlockSpec((tile_h, tile_s), lambda i, j: (i, j)),
        scratch_shapes=[pltpu.VMEM((tile_h, 1), jnp.float32)],
        compiler_params=pltpu.CompilerParams(
            dimension_semantics=("parallel", "arbitrary"),
            vmem_limit_bytes=vmem_limit,
        ),
        cost_estimate=cost,
    )(y2d, w, b2d, x2d)

    out = out[:hidden_dim, :spatial]
    return out.reshape(1, hidden_dim * spatial)


def _reference(x, y, w, b):
    att = jax.nn.sigmoid(y @ w.T + b)                       # (1, hidden)
    return (x * att[:, :, None, None]).reshape(1, -1)


def _run_case(dim_x, dim_y, hidden_dim, seed):
    key = jax.random.PRNGKey(seed)
    kx, ky, kw, kb = jax.random.split(key, 4)
    x = jax.random.normal(kx, (1, hidden_dim, dim_x, dim_x), dtype=jnp.float32)
    y = jax.random.normal(ky, (1, dim_y), dtype=jnp.float32)
    # nn.Linear(dim_y, hidden_dim): W is (out, in) = (hidden, dim_y), b is (hidden,).
    w = jax.random.normal(kw, (hidden_dim, dim_y), dtype=jnp.float32) * 0.1
    b = jax.random.normal(kb, (hidden_dim,), dtype=jnp.float32) * 0.1

    z = gated_attention(x, y, w, b, dim_x, hidden_dim)
    z = jax.block_until_ready(z)

    z_ref = _reference(x, y, w, b)
    assert z.shape == (1, hidden_dim * dim_x * dim_x)
    assert jnp.allclose(z, z_ref, atol=1e-5, rtol=1e-5)


if __name__ == "__main__":
    # Aligned case: spatial = 16*16 = 256 (2 * 128 lanes), hidden = 32.
    _run_case(dim_x=16, dim_y=64, hidden_dim=32, seed=0)
    # Unaligned case (module docstring example uses dim_x=12): exercises the
    # wrapper-side (8, 128) padding + slice path.
    _run_case(dim_x=12, dim_y=48, hidden_dim=20, seed=0)

    print("KERNEL_OK")
</pallas_src>

<mosaic_0001>
module attributes {stable_mosaic.version = 11 : i64} {
  func.func @_gated_attention_kernel(%arg0: i32, %arg1: i32, %arg2: memref<1x64xf32, #tpu.memory_space<vmem>>, %arg3: memref<32x64xf32, #tpu.memory_space<vmem>>, %arg4: memref<32x1xf32, #tpu.memory_space<vmem>>, %arg5: memref<32x256xf32, #tpu.memory_space<vmem>>, %arg6: memref<32x256xf32, #tpu.memory_space<vmem>>, %arg7: memref<32x1xf32, #tpu.memory_space<vmem>>) attributes {dimension_semantics = [#tpu.dimension_semantics<parallel>, #tpu.dimension_semantics<arbitrary>], iteration_bounds = array<i64: 1, 1>, scalar_prefetch = 0 : i64, scratch_operands = 1 : i64, tpu.core_type = #tpu.core_type<tc>, window_params = [{pipeline_mode = #tpu.pipeline_mode<synchronous>, transform_indices = @transform_0, window_bounds = array<i64: 1, 64>}, {transform_indices = @transform_1, window_bounds = array<i64: 32, 64>}, {transform_indices = @transform_2, window_bounds = array<i64: 32, 1>}, {transform_indices = @transform_3, window_bounds = array<i64: 32, 256>}, {transform_indices = @transform_4, window_bounds = array<i64: 32, 256>}]} {
    %c0_i32 = arith.constant 0 : i32
    %0 = arith.cmpi eq, %arg1, %c0_i32 : i32
    %1 = arith.extui %0 : i1 to i32
    %c0_i32_0 = arith.constant 0 : i32
    %2 = arith.cmpi ne, %1, %c0_i32_0 : i32
    scf.if %2 {
      %c0_6 = arith.constant 0 : index
      %c0_7 = arith.constant 0 : index
      %8 = vector.load %arg3[%c0_6, %c0_7] : memref<32x64xf32, #tpu.memory_space<vmem>>, vector<32x64xf32>
      %c0_8 = arith.constant 0 : index
      %c0_9 = arith.constant 0 : index
      %9 = vector.load %arg2[%c0_8, %c0_9] : memref<1x64xf32, #tpu.memory_space<vmem>>, vector<1x64xf32>
      %10 = vector.broadcast %9 : vector<1x64xf32> to vector<32x64xf32>
      %11 = arith.mulf %8, %10 : vector<32x64xf32>
      %cst = arith.constant dense<0.000000e+00> : vector<32xf32>
      %12 = vector.multi_reduction <add>, %11, %cst [1] : vector<32x64xf32> to vector<32xf32>
      %13 = vector.shape_cast %12 : vector<32xf32> to vector<32x1xf32>
      %c0_10 = arith.constant 0 : index
      %c0_11 = arith.constant 0 : index
      %14 = vector.load %arg4[%c0_10, %c0_11] : memref<32x1xf32, #tpu.memory_space<vmem>>, vector<32x1xf32>
      %15 = arith.addf %13, %14 : vector<32x1xf32>
      %16 = arith.negf %15 : vector<32x1xf32>
      %17 = math.exp %16 : vector<32x1xf32>
      %cst_12 = arith.constant 1.000000e+00 : f32
      %18 = vector.broadcast %cst_12 : f32 to vector<32x1xf32>
      %19 = arith.addf %18, %17 : vector<32x1xf32>
      %20 = arith.divf %18, %19 : vector<32x1xf32>
      %c0_13 = arith.constant 0 : index
      %c0_14 = arith.constant 0 : index
      %21 = vector.load %arg7[%c0_13, %c0_14] : memref<32x1xf32, #tpu.memory_space<vmem>>, vector<32x1xf32>
      tpu.vector_store %arg7[%c0_13, %c0_14], %20 {strides = array<i32>} : memref<32x1xf32, #tpu.memory_space<vmem>>, vector<32x1xf32>,
    } else {
    }
    %c0 = arith.constant 0 : index
    %c0_1 = arith.constant 0 : index
    %3 = vector.load %arg5[%c0, %c0_1] : memref<32x256xf32, #tpu.memory_space<vmem>>, vector<32x256xf32>
    %c0_2 = arith.constant 0 : index
    %c0_3 = arith.constant 0 : index
    %4 = vector.load %arg7[%c0_2, %c0_3] : memref<32x1xf32, #tpu.memory_space<vmem>>, vector<32x1xf32>
    %5 = vector.broadcast %4 : vector<32x1xf32> to vector<32x256xf32>
    %6 = arith.mulf %3, %5 : vector<32x256xf32>
    %c0_4 = arith.constant 0 : index
    %c0_5 = arith.constant 0 : index
    %7 = vector.load %arg6[%c0_4, %c0_5] : memref<32x256xf32, #tpu.memory_space<vmem>>, vector<32x256xf32>
    tpu.vector_store %arg6[%c0_4, %c0_5], %6 {strides = array<i32>} : memref<32x256xf32, #tpu.memory_space<vmem>>, vector<32x256xf32>,
    return
  }
  func.func @transform_0(%arg0: i32, %arg1: i32) -> (i32, i32) {
    %c0_i32 = arith.constant 0 : i32
    %c0_i32_0 = arith.constant 0 : i32
    %c0_i32_1 = arith.constant 0 : i32
    return %c0_i32, %c0_i32_0 : i32, i32
  }
  func.func @transform_1(%arg0: i32, %arg1: i32) -> (i32, i32) {
    %c0_i32 = arith.constant 0 : i32
    %c0_i32_0 = arith.constant 0 : i32
    return %arg0, %c0_i32 : i32, i32
  }
  func.func @transform_2(%arg0: i32, %arg1: i32) -> (i32, i32) {
    %c0_i32 = arith.constant 0 : i32
    %c0_i32_0 = arith.constant 0 : i32
    return %arg0, %c0_i32 : i32, i32
  }
  func.func @transform_3(%arg0: i32, %arg1: i32) -> (i32, i32) {
    %c0_i32 = arith.constant 0 : i32
    return %arg0, %arg1 : i32, i32
  }
  func.func @transform_4(%arg0: i32, %arg1: i32) -> (i32, i32) {
    %c0_i32 = arith.constant 0 : i32
    return %arg0, %arg1 : i32, i32
  }
}

</mosaic_0001>

<bundles_post_ra>
// kernel: tpu_custom_call.1
= control target key start
LH: loop header
LB: loop body
LE: loop exit
PB: predicated region body
PF: predicated region fallthrough
CT: control target
= control target key end

     0   :  { %9 = vsyncpa [#allocation4], 0  ;;  %s329_s0 = inlined_call_operand.vmem [shape: f32[1,64], index: 0, kind: input, shape index: {}]   ;;  %s330_s1 = inlined_call_operand.vmem [shape: f32[32,64], index: 1, kind: input, shape index: {}]   ;;  %s331_s2 = inlined_call_operand.vmem [shape: f32[32,1], index: 2, kind: input, shape index: {}]   ;;  %s332_s3 = inlined_call_operand.hbm [shape: f32[32,256], index: 3, kind: input, shape index: {}]   ;;  %s333_s4 = inlined_call_operand.hbm [shape: f32[32,256], index: 4, kind: output, shape index: {}]  }
   0x1   :  { %10 = vsyncpa [#allocation5], 0  ;;  %s242_s15 = smov [#allocation3]   ;;  %s194_s19 = scalar_lea.hbm %s332_s3, 1024 }
   0x2   :  { %s22_s16 = sshll.u32 %s242_s15, 4  ;;  %p195_p0 = scmp.ne.s32.totalorder %s332_s3, %s194_s19  ;;  %s23_s16 = int_to_ptr.vmem [resolvable:$true] %s22_s16 }
   0x3   :  { %p198_p1 = scmp.lt.u32.totalorder %s194_s19, %s332_s3 }
   0x5   :  { %p200_p2 = pnand %p198_p1, %p195_p0 }
   0x7   :  { %203 = shalt.err (!%p200_p2)
}
   0x8   :  { %s204_s24 = scalar_lea.vmem %s23_s16, 1024  ;;  %p209_p4 = scmp.lt.s32.totalorder %s23_s16, %s23_s16 }
   0x9   :  { %p205_p3 = scmp.ne.s32.totalorder %s23_s16, %s204_s24  ;;  %p210_p5 = scmp.lt.s32.totalorder %s204_s24, %s204_s24 }
   0xb   :  { %p211_p6 = por %p210_p5, %p209_p4 }
   0xd   :  { %p212_p7 = pnand %p211_p6, %p205_p3 }
   0xf   :  { %215 = shalt.err (!%p212_p7)
}
  0x10   :  { %s243_s25 = smov 256   ;;  %s244_s26 = smov 16  }
  0x11   :  { %28 = dma.hbm_to_vmem [thread:$0]  %s332_s3, 1024, %s23_s16, [#allocation4], %s243_s25, %s243_s25, %s244_s26  }
  0x12   :  { %238 = dma.done.wait [#allocation4], 1024  }
  0x13   :  { %239 = vsyncadd [#allocation4], 4294966272  ;;  %v36_v0 = vld [vmem:[%s330_s1] sm:$0xff]  ;;  %vm51_vm0 = vcmask 523264   ;;  %v37_v2 = vld [vmem:[%s330_s1 + $0x8] sm:$0xff]  ;;  %v245_v13 = vmov 0  }
  0x14   :  { %v166_v1 = vld [vmem:[%s329_s0] ss:$0 sm:$0xff]  ;;  %v38_v5 = vld [vmem:[%s330_s1 + $0x10] sm:$0xff]  ;;  %v39_v6 = vld [vmem:[%s330_s1 + $0x18] sm:$0xff]  ;;  %176 = vset.pattern.permute.xlu0 %v245_v13  ;;  %177 = vset.pattern.permute.xlu1 %v245_v13  ;;  %vm96_vm1 = vcmask 7168  }
  0x15   :  { %v47_v3 = vmul.f32 %v166_v1, %v36_v0  ;;  %v48_v4 = vmul.f32 %v166_v1, %v37_v2  ;;  %v49_v7 = vmul.f32 %v166_v1, %v38_v5  ;;  %v50_v8 = vmul.f32 %v166_v1, %v39_v6  ;;  %v64_v14 = vld [vmem:[%s331_s2] sm:$0xff]  ;;  %v66_v15 = vld [vmem:[%s331_s2 + $0x10] sm:$0xff]  ;;  %v65_v19 = vld [vmem:[%s331_s2 + $0x8] sm:$0xff] }
  0x16   :  { %v67_v22 = vld [vmem:[%s331_s2 + $0x18] sm:$0xff]  ;;  %v101_v46 = vld [vmem:[#allocation3] sm:$0xff]  ;;  %v102_v47 = vld [vmem:[#allocation3 + $0x8] sm:$0xff]  ;;  %s246_s2 = smov [#allocation6]  }
  0x17   :  { %v52_v9 = vsel %vm51_vm0, %v47_v3, 0.0  ;;  %v58_v10 = vsel %vm51_vm0, %v49_v7, 0.0  ;;  %v55_v11 = vsel %vm51_vm0, %v48_v4, 0.0  ;;  %v61_v12 = vsel %vm51_vm0, %v50_v8, 0.0  ;;  %v103_v51 = vld [vmem:[#allocation3 + $0x10] sm:$0xff]  ;;  %v104_v52 = vld [vmem:[#allocation3 + $0x18] sm:$0xff] }
  0x18   :  { %53 = vadd.xlane.f32.xlu0 %v52_v9  ;;  %59 = vadd.xlane.f32.xlu1 %v58_v10  ;;  %v105_v56 = vld [vmem:[#allocation3 + $0x20] sm:$0xff]  ;;  %v106_v57 = vld [vmem:[#allocation3 + $0x28] sm:$0xff]  ;;  %v107_v61 = vld [vmem:[#allocation3 + $0x30] sm:$0xff]  ;;  %s154_s18 = sshll.u32 %s246_s2, 4  ;;  %s155_s18 = int_to_ptr.vmem [resolvable:$true] %s154_s18 }
  0x19   :  { %v108_v62 = vld [vmem:[#allocation3 + $0x38] sm:$0xff]  ;;  %s216_s19 = scalar_lea.vmem %s155_s18, 1024  ;;  %p221_p9 = scmp.lt.s32.totalorder %s155_s18, %s155_s18 }
  0x1a   :  { %p217_p8 = scmp.ne.s32.totalorder %s155_s18, %s216_s19  ;;  %p222_p10 = scmp.lt.s32.totalorder %s216_s19, %s216_s19 }
  0x1c   :  { %56 = vadd.xlane.f32.xlu0 %v55_v11  ;;  %62 = vadd.xlane.f32.xlu1 %v61_v12  ;;  %p223_p11 = por %p222_p10, %p221_p9 }
  0x1e   :  { %p224_p12 = pnand %p223_p11, %p217_p8 }
  0xa5   :  { %v54_v16 = vpop.xlane.xlu0 %53  ;;  %v60_v18 = vpop.xlane.xlu1 %59 }
  0xa6   :  { %v68_v17 = vadd.f32 %v64_v14, %v54_v16  ;;  %v70_v20 = vadd.f32 %v66_v15, %v60_v18 }
  0xa8   :  { %v167_v21 = vmul.f32 -1.442695, %v68_v17  ;;  %v169_v24 = vmul.f32 -1.442695, %v70_v20 }
  0xa9   :  { %v57_v23 = vpop.xlane.xlu0 %56  ;;  %v63_v26 = vpop.xlane.xlu1 %62 }
  0xaa   :  { %178 = vpow2.f32 %v167_v21  ;;  %v69_v25 = vadd.f32 %v65_v19, %v57_v23  ;;  %v71_v27 = vadd.f32 %v67_v22, %v63_v26 }
  0xab   :  { %180 = vpow2.f32 %v169_v24 }
  0xac   :  { %v168_v28 = vmul.f32 -1.442695, %v69_v25  ;;  %v170_v29 = vmul.f32 -1.442695, %v71_v27 }
  0xae   :  { %182 = vpow2.f32 %v168_v28 }
  0xaf   :  { %184 = vpow2.f32 %v170_v29 }
  0xb4   :  { %v179_v30 = vpop.eup %178 }
  0xb5   :  { %v181_v31 = vpop.eup %180  ;;  %v84_v32 = vadd.f32 1.0, %v179_v30 }
  0xb6   :  { %v86_v33 = vadd.f32 1.0, %v181_v31 }
  0xb7   :  { %186 = vrcp.f32 %v84_v32 }
  0xb8   :  { %v183_v34 = vpop.eup %182  ;;  %188 = vrcp.f32 %v86_v33 }
  0xb9   :  { %v185_v35 = vpop.eup %184  ;;  %v85_v36 = vadd.f32 1.0, %v183_v34 }
  0xba   :  { %v87_v37 = vadd.f32 1.0, %v185_v35 }
  0xbb   :  { %190 = vrcp.f32 %v85_v36 }
  0xbc   :  { %192 = vrcp.f32 %v87_v37 }
  0xc1   :  { %v187_v38 = vpop.eup %186 }
  0xc2   :  { %v189_v39 = vpop.eup %188  ;;  %97 = vst.msk [vmem:[#allocation2] sm:$0xff] %vm96_vm1, %v187_v38 }
  0xc3   :  { %99 = vst.msk [vmem:[#allocation2 + $0x10] sm:$0xff] %vm96_vm1, %v189_v39 }
  0xc5   :  { %v191_v40 = vpop.eup %190 }
  0xc6   :  { %v193_v41 = vpop.eup %192  ;;  %98 = vst.msk [vmem:[#allocation2 + $0x8] sm:$0xff] %vm96_vm1, %v191_v40 }
  0xc7   :  { %100 = vst.msk [vmem:[#allocation2 + $0x18] sm:$0xff] %vm96_vm1, %v193_v41 }
  0xc9   :  { %v109_v42 = vld [vmem:[#allocation2] sm:$0xff] }
  0xca   :  { %115 = vperm.xlu0 %176, %v109_v42   ;;  %v111_v44 = vld [vmem:[#allocation2 + $0x10] sm:$0xff] }
  0xcd   :  { %v110_v43 = vld [vmem:[#allocation2 + $0x8] sm:$0xff] }
  0xce   :  { %120 = vperm.xlu1 %177, %v110_v43   ;;  %v112_v45 = vld [vmem:[#allocation2 + $0x18] sm:$0xff] }
  0xd2   :  { %125 = vperm.xlu1 %177, %v111_v44  }
  0xd6   :  { %130 = vperm.xlu1 %177, %v112_v45  }
 0x149   :  { %v116_v48 = vpop.permute.xlu0 %115 }
 0x14a   :  { %v133_v49 = vmul.f32 %v116_v48, %v101_v46  ;;  %v134_v50 = vmul.f32 %v116_v48, %v102_v47 }
 0x14c   :  { %141 = vst [vmem:[#allocation6] sm:$0xff] %v133_v49  ;;  %142 = vst [vmem:[#allocation6 + $0x8] sm:$0xff] %v134_v50 }
 0x14d   :  { %v121_v53 = vpop.permute.xlu1 %120 }
 0x14e   :  { %v135_v54 = vmul.f32 %v121_v53, %v103_v51  ;;  %v136_v55 = vmul.f32 %v121_v53, %v104_v52 }
 0x150   :  { %143 = vst [vmem:[#allocation6 + $0x10] sm:$0xff] %v135_v54  ;;  %144 = vst [vmem:[#allocation6 + $0x18] sm:$0xff] %v136_v55 }
 0x151   :  { %v126_v58 = vpop.permute.xlu1 %125 }
 0x152   :  { %v137_v59 = vmul.f32 %v126_v58, %v105_v56  ;;  %v138_v60 = vmul.f32 %v126_v58, %v106_v57 }
 0x154   :  { %145 = vst [vmem:[#allocation6 + $0x20] sm:$0xff] %v137_v59  ;;  %146 = vst [vmem:[#allocation6 + $0x28] sm:$0xff] %v138_v60 }
 0x155   :  { %v131_v63 = vpop.permute.xlu1 %130 }
 0x156   :  { %v139_v0 = vmul.f32 %v131_v63, %v107_v61  ;;  %v140_v1 = vmul.f32 %v131_v63, %v108_v62 }
 0x158   :  { %147 = vst [vmem:[#allocation6 + $0x30] sm:$0xff] %v139_v0  ;;  %148 = vst [vmem:[#allocation6 + $0x38] sm:$0xff] %v140_v1 }
 0x159   :  { %227 = shalt.err (!%p224_p12)
}
 0x15a   :  { %s228_s22 = scalar_lea.hbm %s333_s4, 1024 }
 0x15b   :  { %p229_p13 = scmp.ne.s32.totalorder %s333_s4, %s228_s22  ;;  %p232_p0 = scmp.lt.u32.totalorder %s228_s22, %s333_s4 }
 0x15d   :  { %p234_p1 = pnand %p232_p0, %p229_p13 }
 0x15f   :  { %237 = shalt.err (!%p234_p1)
}
 0x160   :  { %160 = dma.vmem_to_hbm [thread:$0]  %s155_s18, 1024, %s333_s4, [#allocation5], %s243_s25, %s243_s25, %s244_s26  }
 0x161   :  { %240 = dma.done.wait [#allocation5], 1024  }
 0x162   :  { %241 = vsyncadd [#allocation5], 4294966272 }
 0x163   :  { %164 = vsyncpa [#allocation4], 1 }
 0x164   :  { %165 = vsyncpa [#allocation5], 1 }

</bundles_post_ra>
